<compile_context>
chip_gen: v6e
topology: v6e:2x2x1
jax: 0.10.0
libtpu: 0.0.40
codegen_flags: <defaults>
</compile_context>

<pallas_src>
import math

import jax
import jax.numpy as jnp
from jax.experimental import pallas as pl
from jax.experimental.pallas import tpu as pltpu


# ---------------------------------------------------------------------------
# helpers
# ---------------------------------------------------------------------------
def _round_up(v: int, m: int) -> int:
    return ((v + m - 1) // m) * m


def _erf(z):
    # Abramowitz & Stegun 7.1.26 rational approximation, |error| <= ~1.5e-7
    # (slightly looser with the approximate EUP reciprocal, still << 1e-3).
    p = 0.3275911
    a1, a2, a3, a4, a5 = (0.254829592, -0.284496736, 1.421413741,
                          -1.453152027, 1.061405429)
    az = jnp.abs(z)
    # divide -> EUP slot (frees the VALU, which binds for narrow feature dims)
    t = pl.reciprocal(1.0 + p * az, approx=True)
    poly = t * (a1 + t * (a2 + t * (a3 + t * (a4 + t * a5))))
    e = 1.0 - poly * jnp.exp(-az * az)
    return jnp.where(z < 0.0, -e, e)


def _gelu_exact(x):
    # Matches torch.nn.GELU() (exact erf form) to well under 1e-3.
    return 0.5 * x * (1.0 + _erf(x * (1.0 / math.sqrt(2.0))))


# ---------------------------------------------------------------------------
# kernel
# ---------------------------------------------------------------------------
def _mlp_kernel(x_ref, w1_ref, b1_ref, w2_ref, b2_ref, o_ref, acc_ref):
    """One grid step = one (row tile, hidden slice).

    x_ref:  (tm, Cin_p)      compute dtype
    w1_ref: (Cin_p, th)      compute dtype (hidden slice)
    b1_ref: (1, th)          f32
    w2_ref: (th, Cout_p)     compute dtype (hidden slice)
    b2_ref: (1, Cout_p)      f32
    o_ref:  (tm, Cout_p)     output dtype
    acc_ref:(tm, Cout_p)     f32 scratch accumulator over hidden slices
    """
    h_idx = pl.program_id(1)

    @pl.when(h_idx == 0)
    def _init():
        acc_ref[...] = jnp.zeros_like(acc_ref)

    # fc1 on this hidden slice, f32 accumulation on the MXU.
    h = jnp.dot(x_ref[...], w1_ref[...], preferred_element_type=jnp.float32)
    h = h + b1_ref[...]
    h = _gelu_exact(h)
    # TODO(synk): nn.Dropout(p=0.0) / eval mode is the identity -> omitted.

    # fc2 partial product, accumulated over hidden slices.
    acc_ref[...] += jnp.dot(h.astype(w2_ref.dtype), w2_ref[...],
                            preferred_element_type=jnp.float32)

    @pl.when(h_idx == pl.num_programs(1) - 1)
    def _finalize():
        o_ref[...] = (acc_ref[...] + b2_ref[...]).astype(o_ref.dtype)


# ---------------------------------------------------------------------------
# tiling heuristics
# ---------------------------------------------------------------------------
def _footprint_bytes(tm, th, c_in_p, c_out_p, cbytes, obytes):
    # Double-buffered pipelined operands + f32 accumulator scratch + the
    # (tm, th) f32 intermediate and its cast copy for the second dot.
    pipelined = 2 * cbytes * (tm * c_in_p + c_in_p * th + th * c_out_p)
    pipelined += 2 * 4 * (th + c_out_p)              # f32 biases
    pipelined += 2 * obytes * tm * c_out_p           # output tile
    acc = 4 * tm * c_out_p
    tmp = tm * th * (4 + cbytes)
    return pipelined + acc + tmp


def _choose_tiles(m, c_in_p, hidden_p, c_out_p, cbytes, obytes, budget,
                  block_rows, row_align):
    # Row-tile upper bound: user cap, total rows, and >= 2 row tiles whenever
    # possible so the 'parallel' axis feeds both v7x TensorCores.
    tm = min(block_rows, _round_up(m, row_align))
    if m >= 2 * row_align:
        tm = min(tm, _round_up((m + 1) // 2, row_align))
    tm = max(row_align, (tm // row_align) * row_align)

    while True:
        th = hidden_p
        while th > 128 and _footprint_bytes(tm, th, c_in_p, c_out_p,
                                            cbytes, obytes) > budget:
            th = max(128, ((th // 2) // 128) * 128)
        if (_footprint_bytes(tm, th, c_in_p, c_out_p, cbytes, obytes) <= budget
                or tm <= row_align):
            return tm, th
        tm = max(row_align, ((tm // 2) // row_align) * row_align)


def _pick_row_blocking(m, tm_target, row_align):
    """Returns (tm, m_pad). Prefers a tm that divides m (no jnp.pad HBM
    round-trip on activations); falls back to padding rows."""
    if m <= row_align:
        return m, m                      # single tile; block == full dim is legal
    if m % row_align == 0:
        lo = max(row_align, ((tm_target // 2) // row_align) * row_align)
        tm = (min(tm_target, m) // row_align) * row_align
        while tm >= lo:
            if m % tm == 0:
                return tm, m
            tm -= row_align
    tm = min(tm_target, _round_up(m, row_align))
    return tm, _round_up(m, tm)


# ---------------------------------------------------------------------------
# wrapper
# ---------------------------------------------------------------------------
def mlp(x, w1, b1, w2, b2, *, compute_dtype=None, block_rows=512,
        vmem_budget_bytes=None):
    """Fused y = gelu(x @ w1 + b1) @ w2 + b2 (dropout p=0.0 -> identity).

    Layout contract (checked):
      x  : (..., in_features)
      w1 : (in_features, hidden)        -- transposed vs. torch.nn.Linear.weight
      b1 : (hidden,) or (1, hidden)
      w2 : (hidden, out_features)
      b2 : (out_features,) or (1, out_features)
    compute_dtype: dtype fed to the MXU (bf16 recommended); accumulation is f32.
    """
    *lead, c_in = x.shape
    if w1.ndim != 2 or w1.shape[0] != c_in:
        raise ValueError("w1 must be (in_features, hidden); got %s" % (w1.shape,))
    hidden = w1.shape[1]
    if w2.ndim != 2 or w2.shape[0] != hidden:
        raise ValueError("w2 must be (hidden, out_features); got %s" % (w2.shape,))
    c_out = w2.shape[1]
    if b1.size != hidden or b2.size != c_out:
        raise ValueError("bias shapes inconsistent with weight shapes")
    b1 = jnp.asarray(b1).reshape(1, hidden)
    b2 = jnp.asarray(b2).reshape(1, c_out)

    out_dtype = x.dtype
    cdt = jnp.dtype(compute_dtype) if compute_dtype is not None else jnp.dtype(x.dtype)
    cbytes = cdt.itemsize
    obytes = jnp.dtype(out_dtype).itemsize
    row_align = {4: 8, 2: 16, 1: 32}.get(cbytes, 8)

    # Lane-dense feature dims: pad to multiples of 128 so loads/stores are
    # unmasked and MXU tiles are full (no-op for typical model widths).
    c_in_p = _round_up(c_in, 128)
    hidden_p = _round_up(hidden, 128)
    c_out_p = _round_up(c_out, 128)

    m = 1
    for d in lead:
        m *= d

    # Per-generation VMEM budget.
    if vmem_budget_bytes is None:
        try:
            cap = int(pltpu.get_tpu_info().vmem_capacity_bytes)
        except Exception:
            cap = 64 * 1024 * 1024      # conservative v7x-sized default
        vmem_budget_bytes = cap // 2
    else:
        cap = 2 * vmem_budget_bytes

    tm_target, th = _choose_tiles(m, c_in_p, hidden_p, c_out_p, cbytes, obytes,
                                  vmem_budget_bytes, block_rows, row_align)
    tm, m_pad = _pick_row_blocking(m, tm_target, row_align)

    # Prepare operands: pad once, cast MXU operands to the compute dtype.
    x2 = x.reshape(m, c_in)
    if m_pad != m or c_in_p != c_in:
        x2 = jnp.pad(x2, ((0, m_pad - m), (0, c_in_p - c_in)))
    x2 = x2.astype(cdt)

    if c_in_p != c_in or hidden_p != hidden:
        w1 = jnp.pad(w1, ((0, c_in_p - c_in), (0, hidden_p - hidden)))
    if hidden_p != hidden:
        b1 = jnp.pad(b1, ((0, 0), (0, hidden_p - hidden)))
    if hidden_p != hidden or c_out_p != c_out:
        w2 = jnp.pad(w2, ((0, hidden_p - hidden), (0, c_out_p - c_out)))
    if c_out_p != c_out:
        b2 = jnp.pad(b2, ((0, 0), (0, c_out_p - c_out)))
    w1 = w1.astype(cdt)
    w2 = w2.astype(cdt)
    b1 = b1.astype(jnp.float32)
    b2 = b2.astype(jnp.float32)

    grid = (m_pad // tm, hidden_p // th)

    cost = pl.CostEstimate(
        flops=2 * m_pad * (c_in_p * hidden_p + hidden_p * c_out_p),
        transcendentals=m_pad * hidden_p,
        bytes_accessed=(x2.size * cbytes + w1.size * cbytes + w2.size * cbytes
                        + b1.size * 4 + b2.size * 4 + m_pad * c_out_p * obytes),
    )

    footprint = _footprint_bytes(tm, th, c_in_p, c_out_p, cbytes, obytes)
    vmem_limit = int(min(cap, max(32 * 1024 * 1024,
                                  footprint * 3 // 2 + (2 << 20))))

    out = pl.pallas_call(
        _mlp_kernel,
        out_shape=jax.ShapeDtypeStruct((m_pad, c_out_p), out_dtype),
        grid_spec=pltpu.PrefetchScalarGridSpec(
            num_scalar_prefetch=0,
            grid=grid,
            in_specs=[
                pl.BlockSpec((tm, c_in_p), lambda i, j: (i, 0)),    # x rows
                pl.BlockSpec((c_in_p, th), lambda i, j: (0, j)),    # w1 hidden slice
                pl.BlockSpec((1, th), lambda i, j: (0, j)),         # b1 hidden slice
                pl.BlockSpec((th, c_out_p), lambda i, j: (j, 0)),   # w2 hidden slice
                pl.BlockSpec((1, c_out_p), lambda i, j: (0, 0)),    # b2
            ],
            out_specs=pl.BlockSpec((tm, c_out_p), lambda i, j: (i, 0)),
            scratch_shapes=[pltpu.VMEM((tm, c_out_p), jnp.float32)],
        ),
        compiler_params=pltpu.CompilerParams(
            dimension_semantics=("parallel", "arbitrary"),
            vmem_limit_bytes=vmem_limit,
        ),
        cost_estimate=cost,
    )(x2, w1, b1, w2, b2)

    out = out[:m, :c_out]
    return out.reshape(*lead, c_out)


def mlp_ref(x, w1, b1, w2, b2):
    """Pure-JAX reference mirroring the PyTorch forward pass (exact-erf GELU)."""
    h = x @ w1 + jnp.reshape(b1, (-1,))
    h = jax.nn.gelu(h, approximate=False)
    return h @ w2 + jnp.reshape(b2, (-1,))


if __name__ == "__main__":
    # Small shapes consistent with the module: in=32, hidden=4*32=128, out=32.
    B, N, C_IN = 2, 16, 32
    HIDDEN, C_OUT = 4 * C_IN, C_IN

    key = jax.random.PRNGKey(0)
    kx, k1, kb1, k2, kb2 = jax.random.split(key, 5)

    x = jax.random.normal(kx, (B, N, C_IN), dtype=jnp.float32)
    # Weights stored as (in, out), i.e. transposed vs. torch.nn.Linear.weight.
    w1 = jax.random.normal(k1, (C_IN, HIDDEN), dtype=jnp.float32) * 0.05
    b1 = jax.random.normal(kb1, (HIDDEN,), dtype=jnp.float32) * 0.01
    w2 = jax.random.normal(k2, (HIDDEN, C_OUT), dtype=jnp.float32) * 0.05
    b2 = jax.random.normal(kb2, (C_OUT,), dtype=jnp.float32) * 0.01

    # bf16 MXU operands + f32 accumulation (perf feedback #1); m=32 rows split
    # into two 16-row tiles so both v7x TensorCores get work.
    out = mlp(x, w1, b1, w2, b2, compute_dtype=jnp.bfloat16)
    out = jax.block_until_ready(out)

    ref = mlp_ref(x, w1, b1, w2, b2)
    assert out.shape == (B, N, C_OUT)
    assert out.dtype == x.dtype
    # Tolerance accounts for bf16-rounded MXU operands and the approximate
    # EUP reciprocal in the erf polynomial (observed error << 1e-2).
    assert jnp.allclose(out, ref, atol=1e-2, rtol=1e-2), "mismatch vs. reference"

    print("KERNEL_OK")
</pallas_src>

<mosaic_0001>
module attributes {stable_mosaic.version = 11 : i64} {
  func.func @_mlp_kernel(%arg0: i32, %arg1: i32, %arg2: memref<16x128xbf16, #tpu.memory_space<vmem>>, %arg3: memref<128x128xbf16, #tpu.memory_space<vmem>>, %arg4: memref<1x128xf32, #tpu.memory_space<vmem>>, %arg5: memref<128x128xbf16, #tpu.memory_space<vmem>>, %arg6: memref<1x128xf32, #tpu.memory_space<vmem>>, %arg7: memref<16x128xf32, #tpu.memory_space<vmem>>, %arg8: memref<16x128xf32, #tpu.memory_space<vmem>>) attributes {dimension_semantics = [#tpu.dimension_semantics<parallel>, #tpu.dimension_semantics<arbitrary>], iteration_bounds = array<i64: 2, 1>, scalar_prefetch = 0 : i64, scratch_operands = 1 : i64, tpu.core_type = #tpu.core_type<tc>, window_params = [{transform_indices = @transform_0, window_bounds = array<i64: 16, 128>}, {transform_indices = @transform_1, window_bounds = array<i64: 128, 128>}, {transform_indices = @transform_2, window_bounds = array<i64: 1, 128>}, {transform_indices = @transform_3, window_bounds = array<i64: 128, 128>}, {pipeline_mode = #tpu.pipeline_mode<synchronous>, transform_indices = @transform_4, window_bounds = array<i64: 1, 128>}, {transform_indices = @transform_5, window_bounds = array<i64: 16, 128>}]} {
    %c0_i32 = arith.constant 0 : i32
    %0 = arith.cmpi eq, %arg1, %c0_i32 : i32
    %1 = arith.extui %0 : i1 to i32
    %c0_i32_0 = arith.constant 0 : i32
    %2 = arith.cmpi ne, %1, %c0_i32_0 : i32
    scf.if %2 {
      %cst_29 = arith.constant 0.000000e+00 : f32
      %57 = vector.broadcast %cst_29 : f32 to vector<16x128xf32>
      %c0_30 = arith.constant 0 : index
      %c0_31 = arith.constant 0 : index
      %58 = vector.load %arg8[%c0_30, %c0_31] : memref<16x128xf32, #tpu.memory_space<vmem>>, vector<16x128xf32>
      tpu.vector_store %arg8[%c0_30, %c0_31], %57 {strides = array<i32>} : memref<16x128xf32, #tpu.memory_space<vmem>>, vector<16x128xf32>,
    } else {
    }
    %c0 = arith.constant 0 : index
    %c0_1 = arith.constant 0 : index
    %3 = vector.load %arg2[%c0, %c0_1] : memref<16x128xbf16, #tpu.memory_space<vmem>>, vector<16x128xbf16>
    %c0_2 = arith.constant 0 : index
    %c0_3 = arith.constant 0 : index
    %4 = vector.load %arg3[%c0_2, %c0_3] : memref<128x128xbf16, #tpu.memory_space<vmem>>, vector<128x128xbf16>
    %cst = arith.constant dense<0.000000e+00> : vector<16x128xf32>
    %5 = tpu.matmul %3, %4, %cst {dimension_numbers = #tpu.dot_dimension_numbers<[1], [0], [0], [1], [0, 0, 1, 1], [], []>} : vector<16x128xbf16>, vector<128x128xbf16>, vector<16x128xf32> -> vector<16x128xf32>
    %c0_4 = arith.constant 0 : index
    %c0_5 = arith.constant 0 : index
    %6 = vector.load %arg4[%c0_4, %c0_5] : memref<1x128xf32, #tpu.memory_space<vmem>>, vector<1x128xf32>
    %7 = vector.broadcast %6 : vector<1x128xf32> to vector<16x128xf32>
    %8 = arith.addf %5, %7 : vector<16x128xf32>
    %cst_6 = arith.constant 5.000000e-01 : f32
    %9 = vector.broadcast %cst_6 : f32 to vector<16x128xf32>
    %10 = arith.mulf %9, %8 : vector<16x128xf32>
    %cst_7 = arith.constant 0.707106769 : f32
    %11 = vector.broadcast %cst_7 : f32 to vector<16x128xf32>
    %12 = arith.mulf %8, %11 : vector<16x128xf32>
    %13 = math.absf %12 : vector<16x128xf32>
    %cst_8 = arith.constant 0.327591091 : f32
    %14 = vector.broadcast %cst_8 : f32 to vector<16x128xf32>
    %15 = arith.mulf %14, %13 : vector<16x128xf32>
    %cst_9 = arith.constant 1.000000e+00 : f32
    %16 = vector.broadcast %cst_9 : f32 to vector<16x128xf32>
    %17 = arith.addf %16, %15 : vector<16x128xf32>
    %18 = tpu.reciprocal %17 {approx = true} : vector<16x128xf32> -> vector<16x128xf32>
    %cst_10 = arith.constant 1.06140542 : f32
    %19 = vector.broadcast %cst_10 : f32 to vector<16x128xf32>
    %20 = arith.mulf %18, %19 : vector<16x128xf32>
    %cst_11 = arith.constant -1.45315206 : f32
    %21 = vector.broadcast %cst_11 : f32 to vector<16x128xf32>
    %22 = arith.addf %21, %20 : vector<16x128xf32>
    %23 = arith.mulf %18, %22 : vector<16x128xf32>
    %cst_12 = arith.constant 1.42141378 : f32
    %24 = vector.broadcast %cst_12 : f32 to vector<16x128xf32>
    %25 = arith.addf %24, %23 : vector<16x128xf32>
    %26 = arith.mulf %18, %25 : vector<16x128xf32>
    %cst_13 = arith.constant -0.284496725 : f32
    %27 = vector.broadcast %cst_13 : f32 to vector<16x128xf32>
    %28 = arith.addf %27, %26 : vector<16x128xf32>
    %29 = arith.mulf %18, %28 : vector<16x128xf32>
    %cst_14 = arith.constant 0.254829586 : f32
    %30 = vector.broadcast %cst_14 : f32 to vector<16x128xf32>
    %31 = arith.addf %30, %29 : vector<16x128xf32>
    %32 = arith.mulf %18, %31 : vector<16x128xf32>
    %cst_15 = arith.constant 0.000000e+00 : f32
    %33 = vector.broadcast %cst_15 : f32 to vector<16x128xf32>
    %34 = arith.subf %33, %13 : vector<16x128xf32>
    %35 = arith.mulf %34, %13 : vector<16x128xf32>
    %36 = math.exp %35 : vector<16x128xf32>
    %37 = arith.mulf %32, %36 : vector<16x128xf32>
    %cst_16 = arith.constant 1.000000e+00 : f32
    %38 = vector.broadcast %cst_16 : f32 to vector<16x128xf32>
    %39 = arith.subf %38, %37 : vector<16x128xf32>
    %cst_17 = arith.constant 0.000000e+00 : f32
    %40 = vector.broadcast %cst_17 : f32 to vector<16x128xf32>
    %41 = arith.cmpf olt, %12, %40 : vector<16x128xf32>
    %cst_18 = arith.constant 0.000000e+00 : f32
    %42 = vector.broadcast %cst_18 : f32 to vector<16x128xf32>
    %43 = arith.subf %42, %39 : vector<16x128xf32>
    %44 = arith.select %41, %43, %39 : vector<16x128xi1>, vector<16x128xf32>
    %cst_19 = arith.constant 1.000000e+00 : f32
    %45 = vector.broadcast %cst_19 : f32 to vector<16x128xf32>
    %46 = arith.addf %45, %44 : vector<16x128xf32>
    %47 = arith.mulf %10, %46 : vector<16x128xf32>
    %c0_20 = arith.constant 0 : index
    %c0_21 = arith.constant 0 : index
    %48 = vector.load %arg8[%c0_20, %c0_21] : memref<16x128xf32, #tpu.memory_space<vmem>>, vector<16x128xf32>
    %49 = arith.truncf %47 : vector<16x128xf32> to vector<16x128xbf16>
    %c0_22 = arith.constant 0 : index
    %c0_23 = arith.constant 0 : index
    %50 = vector.load %arg5[%c0_22, %c0_23] : memref<128x128xbf16, #tpu.memory_space<vmem>>, vector<128x128xbf16>
    %cst_24 = arith.constant dense<0.000000e+00> : vector<16x128xf32>
    %51 = tpu.matmul %49, %50, %cst_24 {dimension_numbers = #tpu.dot_dimension_numbers<[1], [0], [0], [1], [0, 0, 1, 1], [], []>} : vector<16x128xbf16>, vector<128x128xbf16>, vector<16x128xf32> -> vector<16x128xf32>
    %52 = arith.addf %48, %51 : vector<16x128xf32>
    %c0_25 = arith.constant 0 : index
    %c0_26 = arith.constant 0 : index
    %53 = vector.load %arg8[%c0_25, %c0_26] : memref<16x128xf32, #tpu.memory_space<vmem>>, vector<16x128xf32>
    tpu.vector_store %arg8[%c0_25, %c0_26], %52 {strides = array<i32>} : memref<16x128xf32, #tpu.memory_space<vmem>>, vector<16x128xf32>,
    %c0_i32_27 = arith.constant 0 : i32
    %54 = arith.cmpi eq, %arg1, %c0_i32_27 : i32
    %55 = arith.extui %54 : i1 to i32
    %c0_i32_28 = arith.constant 0 : i32
    %56 = arith.cmpi ne, %55, %c0_i32_28 : i32
    scf.if %56 {
      %c0_29 = arith.constant 0 : index
      %c0_30 = arith.constant 0 : index
      %57 = vector.load %arg8[%c0_29, %c0_30] : memref<16x128xf32, #tpu.memory_space<vmem>>, vector<16x128xf32>
      %c0_31 = arith.constant 0 : index
      %c0_32 = arith.constant 0 : index
      %58 = vector.load %arg6[%c0_31, %c0_32] : memref<1x128xf32, #tpu.memory_space<vmem>>, vector<1x128xf32>
      %59 = vector.broadcast %58 : vector<1x128xf32> to vector<16x128xf32>
      %60 = arith.addf %57, %59 : vector<16x128xf32>
      %c0_33 = arith.constant 0 : index
      %c0_34 = arith.constant 0 : index
      %61 = vector.load %arg7[%c0_33, %c0_34] : memref<16x128xf32, #tpu.memory_space<vmem>>, vector<16x128xf32>
      tpu.vector_store %arg7[%c0_33, %c0_34], %60 {strides = array<i32>} : memref<16x128xf32, #tpu.memory_space<vmem>>, vector<16x128xf32>,
    } else {
    }
    return
  }
  func.func @transform_0(%arg0: i32, %arg1: i32) -> (i32, i32) {
    %c0_i32 = arith.constant 0 : i32
    %c0_i32_0 = arith.constant 0 : i32
    return %arg0, %c0_i32 : i32, i32
  }
  func.func @transform_1(%arg0: i32, %arg1: i32) -> (i32, i32) {
    %c0_i32 = arith.constant 0 : i32
    %c0_i32_0 = arith.constant 0 : i32
    return %c0_i32, %arg1 : i32, i32
  }
  func.func @transform_2(%arg0: i32, %arg1: i32) -> (i32, i32) {
    %c0_i32 = arith.constant 0 : i32
    %c0_i32_0 = arith.constant 0 : i32
    return %c0_i32, %arg1 : i32, i32
  }
  func.func @transform_3(%arg0: i32, %arg1: i32) -> (i32, i32) {
    %c0_i32 = arith.constant 0 : i32
    %c0_i32_0 = arith.constant 0 : i32
    return %arg1, %c0_i32 : i32, i32
  }
  func.func @transform_4(%arg0: i32, %arg1: i32) -> (i32, i32) {
    %c0_i32 = arith.constant 0 : i32
    %c0_i32_0 = arith.constant 0 : i32
    %c0_i32_1 = arith.constant 0 : i32
    return %c0_i32, %c0_i32_0 : i32, i32
  }
  func.func @transform_5(%arg0: i32, %arg1: i32) -> (i32, i32) {
    %c0_i32 = arith.constant 0 : i32
    %c0_i32_0 = arith.constant 0 : i32
    return %arg0, %c0_i32 : i32, i32
  }
}

</mosaic_0001>

<bundles_post_ra>
// kernel: tpu_custom_call.1
= control target key start
LH: loop header
LB: loop body
LE: loop exit
PB: predicated region body
PF: predicated region fallthrough
CT: control target
= control target key end

     0   :  { %s1379_s0 = inlined_call_operand.hbm [shape: bf16[32,128], index: 0, kind: input, shape index: {}]   ;;  %s1380_s1 = inlined_call_operand.hbm [shape: bf16[128,128], index: 1, kind: input, shape index: {}]   ;;  %s1381_s2 = inlined_call_operand.vmem [shape: f32[1,128], index: 2, kind: input, shape index: {}]   ;;  %s1382_s3 = inlined_call_operand.hbm [shape: bf16[128,128], index: 3, kind: input, shape index: {}]   ;;  %s1383_s4 = inlined_call_operand.vmem [shape: f32[1,128], index: 4, kind: input, shape index: {}]   ;;  %s1384_s5 = inlined_call_operand.hbm [shape: f32[32,128], index: 5, kind: output, shape index: {}]  }
   0x1   :  { %1387 = sst [smem:[#allocation13_spill]] %s1380_s1 }
   0x2   :  { %10 = vsyncpa [#allocation4], 0 }
   0x3   :  { %12 = vsyncpa [#allocation4 + $0x1], 0 }
   0x4   :  { %13 = vsyncpa [#allocation7], 0 }
   0x5   :  { %14 = vsyncpa [#allocation5], 0 }
   0x6   :  { %16 = vsyncpa [#allocation5 + $0x1], 0  ;;  %s1172_s18 = smov 0   ;;  %s1174_s19 = smov 0  }
   0x7   :  { %s1176_s20 = smov 0   ;;  %s1178_s21 = smov 0  }
   0x8   :  { %s1180_s22 = smov 0   ;;  %s1182_s23 = smov 0  }
   0x9 LB: > { %s753_s24 = sadd.s32 4294967295, %s1130_s23   ;;  %s754_s25 = sadd.s32 4294967294, %s1130_s23   ;;  %s1130_s23 = sphi %s1182_s23, %s22_s23   ;;  %s1126_s22 = sphi %s1180_s22, %s1405_s22   ;;  %s1122_s21 = sphi %s1178_s21, %s1404_s21   ;;  %s1118_s20 = sphi %s1176_s20, %s1403_s20   ;;  %s1114_s19 = sphi %s1174_s19, %s1402_s19   ;;  %s1110_s18 = sphi %s1172_s18, %s1401_s18  }
   0xa   : > { %p54_p0 = scmp.ne.s32.totalorder %s1114_s19, %s1110_s18  ;;  %p1206_p1 = scmp.eq.s32.totalorder %s753_s24, 0 }
   0xb   : > { %p1210_p2 = scmp.eq.s32.totalorder %s753_s24, 1  ;;  %p183_p3 = scmp.eq.s32.totalorder %s754_s25, 1 }
   0xc   : > { %p1216_p4 = por %p1206_p1, %p54_p0  ;;  %p755_p5 = scmp.ge.s32.totalorder %s1130_s23, 1 }
   0xd   : > { %p1221_p6 = por %p183_p3, %p54_p0  ;;  %p190_p7 = scmp.lt.s32.totalorder %s1130_s23, 3 }
   0xe   : > { %s1132_s6 = smov [#allocation6]   ;;  %s1133_s9 = smov [#allocation8]  }
   0xf   : > { %s1391_s29 = scalar_select %p1221_p6, 1, 0 }
  0x10   : > { %p1226_p8 = pnand %p755_p5, %p190_p7  ;;  %s204_s7 = sshll.u32 %s1132_s6, 4  ;;  %s205_s7 = int_to_ptr.vmem [resolvable:$true] %s204_s7 }
  0x11   : > { %s226_s10 = sshll.u32 %s1133_s9, 4  ;;  %s977_s11 = scalar_lea.vmem %s205_s7, 1024  ;;  %s227_s10 = int_to_ptr.vmem [resolvable:$true] %s226_s10 }
  0x12   : > { %p864_p9 = pneg %p1226_p8  ;;  %p978_p13 = scmp.ne.s32.totalorder %s205_s7, %s977_s11 }
  0x13   : > { %p985_p5 = scmp.lt.s32.totalorder %s205_s7, %s205_s7  ;;  %p986_p7 = scmp.lt.s32.totalorder %s977_s11, %s977_s11 }
  0x14   : > { %p1235_p11 = pnand %p864_p9, %p1206_p1 }
  0x15   : > { %p987_p10 = por %p986_p7, %p985_p5 }
  0x16   : > { %p968_p12 = pneg %p1235_p11 }
  0x18   : > { %p980_p0 = pnand %p978_p13, %p968_p12 }
  0x1a   : > { %p981_p3 = pneg %p980_p0 }
  0x1c   : > { %p988_p9 = pnand %p987_p10, %p981_p3 }
  0x1e   : > { %991 = shalt.err (!%p988_p9)
}
  0x1f   : > { %s1385_s12 = smov 64   ;;  %s1386_s13 = smov 4  }
  0x20   : > { %s1394_s1 = sld [smem:[#allocation13_spill]]  ;;  %s1003_s16 = scalar_lea.vmem %s227_s10, 1024 }
  0x21   : > { %p1004_p13 = scmp.ne.s32.totalorder %s227_s10, %s1003_s16  ;;  %p1011_p10 = scmp.lt.s32.totalorder %s227_s10, %s227_s10 }
  0x22   : > { %p1012_p3 = scmp.lt.s32.totalorder %s1003_s16, %s1003_s16 }
  0x23   : > { %p1006_p0 = pnand %p1004_p13, %p968_p12 }
  0x24   : > { %p1013_p7 = por %p1012_p3, %p1011_p10 }
  0x25   : > { %p1007_p5 = pneg %p1006_p0 }
  0x26   : > { %867 = dma.hbm_to_vmem [thread:$0]  (!%p1235_p11), %s1394_s1, 1024, %s205_s7, [#allocation7], %s1385_s12, %s1385_s12, %s1386_s13  }
  0x27   : > { %p1014_p9 = pnand %p1013_p7, %p1007_p5 }
  0x29   : > { %1017 = shalt.err (!%p1014_p9)
}
  0x2a   : > { %870 = dma.hbm_to_vmem [thread:$0]  (!%p1235_p11), %s1382_s3, 1024, %s227_s10, [#allocation7], %s1385_s12, %s1385_s12, %s1386_s13  }
  0x2b   : > { %s34_s25 = sadd.s32 1, %s1126_s22  ;;  %s41_s6 = sadd.s32 1, %s1118_s20 }
  0x2c   : > { %p36_p12 = scmp.ge.s32.totalorder %s34_s25, 2  ;;  %p48_p13 = scmp.ne.s32.totalorder %s1118_s20, %s1114_s19 }
  0x2d   : > { %p49_p0 = scmp.eq.s32.totalorder %s1130_s23, 0  ;;  %p881_p5 = scmp.lt.s32.totalorder %s1130_s23, 2 }
  0x2e   : > { %s1407_s25 = smov (%p36_p12, %s34_s25), 0  ;;  %p1273_p3 = por %p1210_p2, %p48_p13 }
  0x2f   : > { %p50_p10 = por %p49_p0, %p48_p13  ;;  %s38_s8 = ssub.s32 %s1126_s22, %s1407_s25 }
  0x30   : > { %s243_s9 = sand.u32 1, %s1118_s20   ;;  %p39_p7 = scmp.eq.s32.totalorder %s38_s8, 0 }
  0x31   : > { %s760_s10 = sshll.u32 %s243_s9, 3  ;;  %s792_s11 = sshll.u32 %s1126_s22, 7 }
  0x32   : > { %s1282_s14 = scalar_select %p39_p7, %s1118_s20, %s41_s6  }
  0x33   : > { %s253_s17 = scalar_lea.hbm %s1379_s0, %s792_s11  ;;  %s247_s24 = scalar_lea.vmem [#allocation3], %s760_s10 }
  0x34   : > { %s254_s12 = sshll.u32 %s247_s24, 4  ;;  %p1289_p11 = pnand %p881_p5, %p50_p10  ;;  %s255_s12 = int_to_ptr.vmem [resolvable:$true] %s254_s12 }
  0x35   : > { %s244_s13 = scalar_lea.sflag [#allocation4], %s243_s9  ;;  %s1031_s8 = scalar_lea.vmem %s255_s12, 128 }
  0x36   : > { %p1020_p2 = pneg %p1289_p11  ;;  %p1032_p9 = scmp.ne.s32.totalorder %s255_s12, %s1031_s8 }
  0x37   : > { %s1136_s6 = smov [#allocation3]  }
  0x38   : > { %p1034_p12 = pnand %p1032_p9, %p1020_p2  ;;  %s1036_s1 = sshll.u32 %s1136_s6, 4  ;;  %s1037_s1 = int_to_ptr.vmem [resolvable:$false] %s1036_s1 }
  0x39   : > { %s1038_s11 = scalar_lea.vmem %s1037_s1, 256  ;;  %p1039_p0 = scmp.lt.s32.totalorder %s255_s12, %s1037_s1 }
  0x3a   : > { %p1035_p13 = pneg %p1034_p12  ;;  %p1040_p7 = scmp.lt.s32.totalorder %s1038_s11, %s1031_s8 }
  0x3c   : > { %p1041_p6 = por %p1040_p7, %p1039_p0 }
  0x3e   : > { %p1042_p5 = pnand %p1041_p6, %p1035_p13 }
  0x40   : > { %1045 = shalt.err (!%p1042_p5)
}
  0x41   : > { %s1397_s10 = smov 4   ;;  %s1398_s15 = smov 64  }
  0x42   : > { %874 = dma.hbm_to_vmem [thread:$0]  (!%p1289_p11), %s253_s17, 128, %s255_s12, %s244_s13, %s1398_s15, %s1398_s15, %s1397_s10  }
  0x43   : > { %266 = sbr.rel (%p1226_p8) target bundleno = 574 (0x23e), region = 40  ;;  %s1303_s9 = sand.u32 (!%p1226_p8), 1, %s1114_s19  }
  0x44   : > { %s764_s1 = sshll.u32 (!%p1226_p8), %s1303_s9, 3  ;;  %s269_s16 = scalar_lea.sflag (!%p1226_p8), [#allocation4], %s1303_s9 }
  0x45   : > { %s1307_s24 = scalar_lea.vmem (!%p1226_p8), [#allocation3], %s764_s1 }
  0x48   : > { %1097 = dma.done.wait (%p1216_p4), %s269_s16, 128  }
  0x49   : > { %1099 = vsyncadd (%p1216_p4), %s269_s16, 4294967168 }
  0x4a   : > { %1101 = dma.done.wait (%p1206_p1), [#allocation7], 2048  }
  0x4b   : > { %1103 = vsyncadd (%p1206_p1), [#allocation7], 4294965248  ;;  %v1137_v0 = vmov 0.0   ;;  %vm1138_vm0 = vmmov 0   ;;  %v941_v1 = vld [vmem:[#allocation6 + $0x38] sm:$0xff]   ;;  %v942_v2 = vld [vmem:[#allocation6 + $0x30] sm:$0xff]  }
  0x4c   : > { %812 = vmatprep.subr.bf16.mxu0 %v1137_v0  ;;  %828 = vmatprep.mubr.msk.bf16.mxu0 %vm1138_vm0, %v1137_v0  ;;  %v943_v3 = vld [vmem:[#allocation6 + $0x28] sm:$0xff]   ;;  %v944_v4 = vld [vmem:[#allocation6 + $0x20] sm:$0xff]   ;;  %v945_v5 = vld [vmem:[#allocation6 + $0x18] sm:$0xff]   ;;  %s767_s30 = sshll.u32 %s1303_s9, 4  ;;  %s793_s8 = sshll.u32 %s1122_s21, 8 }
  0x4d   : > { %832 = vmatprep.subr.bf16.mxu1 %v1137_v0  ;;  %848 = vmatprep.mubr.msk.bf16.mxu1 %vm1138_vm0, %v1137_v0  ;;  %v946_v6 = vld [vmem:[#allocation6 + $0x10] sm:$0xff]   ;;  %v947_v7 = vld [vmem:[#allocation6 + $0x8] sm:$0xff]   ;;  %v948_v8 = vld [vmem:[#allocation6] sm:$0xff]   ;;  %s309_s17 = scalar_lea.vmem [#allocation9], %s767_s30  ;;  %s1331_s10 = scalar_lea.hbm %s1384_s5, %s793_s8 }
  0x4e   : > { %813 = vmatpush3.bf16.msra.mxu0 %v941_v1  ;;  %v949_v9 = vld [vmem:[%s1307_s24] sm:$0xff]   ;;  %v952_v12 = vld [vmem:[#allocation8 + $0x28] sm:$0xff]   ;;  %v953_v13 = vld [vmem:[#allocation8 + $0x20] sm:$0xff]   ;;  %s637_s27 = sshll.u32 %s309_s17, 4  ;;  %s624_s15 = scalar_lea.sflag [#allocation5], %s1303_s9  ;;  %s1326_s27 = int_to_ptr.vmem [resolvable:$true] %s637_s27 }
  0x4f   : > { %814 = vmatprep.subr.bf16.mxu0 %v1137_v0  ;;  %v950_v10 = vld [vmem:[#allocation8 + $0x38] sm:$0xff]   ;;  %v951_v11 = vld [vmem:[#allocation8 + $0x30] sm:$0xff]   ;;  %v956_v16 = vld [vmem:[#allocation8 + $0x8] sm:$0xff]   ;;  %s1046_s1 = scalar_lea.vmem %s1326_s27, 256  ;;  %s1139_s21 = smov [#allocation9]  }
  0x50   : > { %833 = vmatpush3.bf16.msra.mxu1 %v950_v10  ;;  %v954_v14 = vld [vmem:[#allocation8 + $0x18] sm:$0xff]   ;;  %v955_v15 = vld [vmem:[#allocation8 + $0x10] sm:$0xff]   ;;  %v957_v17 = vld [vmem:[#allocation8] sm:$0xff]   ;;  %p1047_p1 = scmp.ne.s32.totalorder %s1326_s27, %s1046_s1  ;;  %s1050_s16 = sshll.u32 %s1139_s21, 4  ;;  %s1051_s16 = int_to_ptr.vmem [resolvable:$false] %s1050_s16 }
  0x51   : > { %834 = vmatprep.subr.bf16.mxu1 %v1137_v0  ;;  %v768_v18 = vld [vmem:[%s1381_s2] ss:$0 sm:$0xff]  ;;  %s1052_s24 = scalar_lea.vmem %s1051_s16, 512  ;;  %p1053_p8 = scmp.lt.s32.totalorder %s1326_s27, %s1051_s16 }
  0x52   : > { %815 = vmatpush3.bf16.msra.mxu0 %v942_v2  ;;  %p1048_p4 = pnand %p1047_p1, %p1273_p3  ;;  %p1054_p10 = scmp.lt.s32.totalorder %s1052_s24, %s1046_s1 }
  0x53   : > { %816 = vmatprep.subr.bf16.mxu0 %v1137_v0 }
  0x54   : > { %835 = vmatpush3.bf16.msra.mxu1 %v951_v11  ;;  %p1049_p6 = pneg %p1048_p4  ;;  %p1055_p11 = por %p1054_p10, %p1053_p8 }
  0x55   : > { %836 = vmatprep.subr.bf16.mxu1 %v1137_v0 }
  0x56   : > { %817 = vmatpush3.bf16.msra.mxu0 %v943_v3  ;;  %p1056_p2 = pnand %p1055_p11, %p1049_p6 }
  0x57   : > { %818 = vmatprep.subr.bf16.mxu0 %v1137_v0 }
  0x58   : > { %837 = vmatpush3.bf16.msra.mxu1 %v952_v12  ;;  %v786_v12 = vld [vmem:[%s1383_s4] ss:$0 sm:$0xff] }
  0x59   : > { %838 = vmatprep.subr.bf16.mxu1 %v1137_v0 }
  0x5a   : > { %819 = vmatpush3.bf16.msra.mxu0 %v944_v4 }
  0x5b   : > { %820 = vmatprep.subr.bf16.mxu0 %v1137_v0 }
  0x5c   : > { %839 = vmatpush3.bf16.msra.mxu1 %v953_v13 }
  0x5d   : > { %840 = vmatprep.subr.bf16.mxu1 %v1137_v0 }
  0x5e   : > { %821 = vmatpush3.bf16.msra.mxu0 %v945_v5 }
  0x5f   : > { %822 = vmatprep.subr.bf16.mxu0 %v1137_v0 }
  0x60   : > { %841 = vmatpush3.bf16.msra.mxu1 %v954_v14 }
  0x61   : > { %842 = vmatprep.subr.bf16.mxu1 %v1137_v0 }
  0x62   : > { %823 = vmatpush3.bf16.msra.mxu0 %v946_v6 }
  0x63   : > { %824 = vmatprep.subr.bf16.mxu0 %v1137_v0 }
  0x64   : > { %843 = vmatpush3.bf16.msra.mxu1 %v955_v15 }
  0x65   : > { %844 = vmatprep.subr.bf16.mxu1 %v1137_v0 }
  0x66   : > { %825 = vmatpush3.bf16.msra.mxu0 %v947_v7 }
  0x67   : > { %826 = vmatprep.subr.bf16.mxu0 %v1137_v0 }
  0x68   : > { %845 = vmatpush3.bf16.msra.mxu1 %v956_v16 }
  0x69   : > { %846 = vmatprep.subr.bf16.mxu1 %v1137_v0 }
  0x6a   : > { %827 = vmatpush3.bf16.msra.mxu0 %v948_v8 }
  0x6c   : > { %847 = vmatpush3.bf16.msra.mxu1 %v957_v17 }
  0x6d   : > { %829 = vmatmul.mubr.bf16.vlgmr.msra.gmra.mxu0 %v949_v9 }
 0x12d   : > { %v436_v19 = vpop.f32.mrf.mxu0 }
 0x12e   : > { %v437_v20 = vadd.f32 %v768_v18, %v436_v19 }
 0x12f   : > { %v830_v21 = vpop.f32.mrf.mxu0 }
 0x130   : > { %v445_v22 = vmul.f32 0.70710677, %v437_v20  ;;  %v443_v6 = vmul.f32 0.5, %v437_v20 }
 0x131   : > { %v439_v23 = vpop.f32.mrf.mxu0 }
 0x132   : > { %v447_v24 = vand.u32 2147483647, %v445_v22  ;;  %v440_v25 = vadd.f32 %v768_v18, %v439_v23  ;;  %vm485_vm1 = vcmp.lt.f32.partialorder %v445_v22, 0.0 }
 0x133   : > { %v831_v26 = vpop.f32.mrf.mxu0 }
 0x134   : > { %v449_v27 = vmul.f32 0.3275911, %v447_v24  ;;  %v446_v28 = vmul.f32 0.70710677, %v440_v25  ;;  %v473_v33 = vsub.f32 0.0, %v447_v24  ;;  %v444_v7 = vmul.f32 0.5, %v440_v25 }
 0x136   : > { %v451_v29 = vadd.f32 1.0, %v449_v27  ;;  %v448_v30 = vand.u32 2147483647, %v446_v28  ;;  %v475_v34 = vmul.f32 %v473_v33, %v447_v24  ;;  %vm486_vm2 = vcmp.lt.f32.partialorder %v446_v28, 0.0 }
 0x138   : > { %958 = vrcp.f32 %v451_v29  ;;  %v450_v31 = vmul.f32 0.3275911, %v448_v30  ;;  %v474_v35 = vsub.f32 0.0, %v448_v30  ;;  %v477_v38 = vmul.f32 1.442695, %v475_v34 }
 0x13a   : > { %v452_v32 = vadd.f32 1.0, %v450_v31  ;;  %v476_v39 = vmul.f32 %v474_v35, %v448_v30 }
 0x13c   : > { %960 = vrcp.f32 %v452_v32  ;;  %v479_v44 = vmul.f32 1.442695, %v476_v39 }
 0x13d   : > { %962 = vpow2.f32 %v477_v38 }
 0x13e   : > { %964 = vpow2.f32 %v479_v44 }
 0x145   : > { %v959_v36 = vpop.eup %958 }
 0x146   : > { %v455_v37 = vmul.f32 1.0614054, %v959_v36 }
 0x148   : > { %v457_v40 = vadd.f32 -1.4531521, %v455_v37 }
 0x149   : > { %v961_v41 = vpop.eup %960 }
 0x14a   : > { %v459_v42 = vmul.f32 %v959_v36, %v457_v40  ;;  %v456_v43 = vmul.f32 1.0614054, %v961_v41  ;;  %v963_v57 = vpop.eup %962 }
 0x14b   : > { %v965_v62 = vpop.eup %964 }
 0x14c   : > { %v461_v45 = vadd.f32 1.4214138, %v459_v42  ;;  %v458_v46 = vadd.f32 -1.4531521, %v456_v43 }
 0x14e   : > { %v463_v47 = vmul.f32 %v959_v36, %v461_v45  ;;  %v460_v48 = vmul.f32 %v961_v41, %v458_v46 }
 0x150   : > { %v465_v49 = vadd.f32 -0.28449672, %v463_v47  ;;  %v462_v50 = vadd.f32 1.4214138, %v460_v48 }
 0x152   : > { %v467_v51 = vmul.f32 %v959_v36, %v465_v49  ;;  %v464_v52 = vmul.f32 %v961_v41, %v462_v50 }
 0x154   : > { %v469_v53 = vadd.f32 0.2548296, %v467_v51  ;;  %v466_v54 = vadd.f32 -0.28449672, %v464_v52 }
 0x156   : > { %v471_v55 = vmul.f32 %v959_v36, %v469_v53  ;;  %v468_v56 = vmul.f32 %v961_v41, %v466_v54 }
 0x158   : > { %v481_v58 = vmul.f32 %v963_v57, %v471_v55  ;;  %v470_v59 = vadd.f32 0.2548296, %v468_v56 }
 0x15a   : > { %v483_v60 = vsub.f32 1.0, %v481_v58  ;;  %v472_v61 = vmul.f32 %v961_v41, %v470_v59 }
 0x15c   : > { %v487_v63 = vsub.f32 0.0, %v483_v60  ;;  %v482_v0 = vmul.f32 %v965_v62, %v472_v61 }
 0x15e   : > { %v489_v1 = vsel %vm485_vm1, %v487_v63, %v483_v60  ;;  %v484_v2 = vsub.f32 1.0, %v482_v0 }
 0x15f   : > { %v491_v4 = vadd.f32 1.0, %v489_v1 }
 0x160   : > { %v488_v3 = vsub.f32 0.0, %v484_v2 }
 0x161   : > { %v493_v9 = vmul.f32 %v491_v4, %v443_v6 }
 0x162   : > { %v490_v5 = vsel %vm486_vm2, %v488_v3, %v484_v2 }
 0x163   : > { %v492_v8 = vadd.f32 1.0, %v490_v5 }
 0x165   : > { %v494_v10 = vmul.f32 %v492_v8, %v444_v7 }
 0x167   : > { %v497_v11 = vpack.c.bf16 %v494_v10, %v493_v9 }
 0x169   : > { %849 = vmatmul.mubr.bf16.vlgmr.msra.gmra.mxu1 %v497_v11 }
 0x229   : > { %v596_v13 = vpop.f32.mrf.mxu1 }
 0x22a   : > { %v619_v14 = vadd.f32 %v786_v12, %v596_v13 }
 0x22b   : > { %v850_v15 = vpop.f32.mrf.mxu1 }
 0x22c   : > { %621 = vst [vmem:[%s309_s17] sm:$0xff] %v619_v14 }
 0x22d   : > { %v599_v16 = vpop.f32.mrf.mxu1 }
 0x22e   : > { %v620_v17 = vadd.f32 %v786_v12, %v599_v16 }
 0x22f   : > { %v851_v18 = vpop.f32.mrf.mxu1 }
 0x230   : > { %622 = vst [vmem:[%s309_s17 + $0x8] sm:$0xff] %v620_v17 }
 0x231   : > { %1059 = shalt.err (!%p1056_p2)
}
 0x232   : > { %s1060_s26 = scalar_lea.hbm %s1331_s10, 256  ;;  %s1064_s12 = scalar_lea.hbm %s1384_s5, 512 }
 0x233   : > { %p1061_p9 = scmp.ne.s32.totalorder %s1331_s10, %s1060_s26  ;;  %p1065_p0 = scmp.lt.s32.totalorder %s1331_s10, %s1384_s5 }
 0x234   : > { %p1066_p7 = scmp.lt.s32.totalorder %s1064_s12, %s1060_s26 }
 0x235   : > { %p1062_p12 = pnand %p1061_p9, %p1273_p3 }
 0x236   : > { %p1067_p5 = por %p1066_p7, %p1065_p0 }
 0x237   : > { %p1063_p13 = pneg %p1062_p12 }
 0x239   : > { %p1068_p1 = pnand %p1067_p5, %p1063_p13 }
 0x23b   : > { %1071 = shalt.err (!%p1068_p1)
}
 0x23c   : > { %s1140_s8 = smov 128   ;;  %s1141_s6 = smov 8  }
 0x23d   : > { %862 = dma.vmem_to_hbm [thread:$0]  (%p1273_p3), %s1326_s27, 256, %s1331_s10, %s624_s15, %s1140_s8, %s1140_s8, %s1141_s6  }
 0x23e PF: > { %s652_s11 = sand.u32 1, %s1110_s18   ;;  %p1399_p4 = scmp.ne.s32.totalorder %s1391_s29, 0 }
 0x23f   : > { %p1400_p6 = scmp.ge.s32.totalorder %s1130_s23, 2  ;;  %s653_s1 = scalar_lea.sflag [#allocation5], %s652_s11 }
 0x241   : > { %p876_p8 = pnand %p1400_p6, %p1399_p4 }
 0x243   : > { %p877_p10 = pneg %p876_p8 }
 0x245   : > { %1105 = dma.done.wait (%p877_p10), %s653_s1, 256  }
 0x246   : > { %1107 = vsyncadd (%p877_p10), %s653_s1, 4294967040  ;;  %s22_s23 = sadd.s32 1, %s1130_s23   ;;  %s1401_s18 = smov %s1114_s19 }
 0x247   : > { %p19_p11 = scmp.ge.s32.totalorder %s22_s23, 4   ;;  %s1402_s19 = smov %s1118_s20 }
 0x248   : > { %s1403_s20 = smov %s1282_s14  ;;  %s1404_s21 = smov %s1126_s22 }
 0x249   : > { %s1405_s22 = smov %s1407_s25  ;;  %21 = sbr.rel (!%p19_p11) target bundleno = 9 (0x9), region = 106 }
 0x24e   :  { %658 = vsyncpa [#allocation4], 1 }
 0x24f   :  { %660 = vsyncpa [#allocation4 + $0x1], 1 }
 0x250   :  { %661 = vsyncpa [#allocation7], 1 }
 0x251   :  { %662 = vsyncpa [#allocation5], 1 }
 0x252   :  { %664 = vsyncpa [#allocation5 + $0x1], 1 }

</bundles_post_ra>
